<compile_context>
chip_gen: v5e
topology: v5e:2x2
jax: 0.10.0
libtpu: 0.0.40
codegen_flags: <defaults>
</compile_context>

<pallas_src>
import functools

import jax
import jax.numpy as jnp
import numpy as np
from jax.experimental import pallas as pl
from jax.experimental.pallas import tpu as pltpu

LANES = 128
MIN_TILE_ELEMS = 8 * LANES          # minimal alignment (one (8,128) tile)
TILE_ROWS = 2048                    # rows per grid block (1 MiB f32 / input)
VMEM_LIMIT_BYTES = 32 * 1024 * 1024  # explicit scoped-VMEM budget (safe on v5e..v7x)


def _int_pow(z, gi):
    """z**gi for small non-negative integer gi via repeated squaring (VALU only)."""
    result = None
    base = z
    e = gi
    while e > 0:
        if e & 1:
            result = base if result is None else result * base
        e >>= 1
        if e:
            base = base * base
    return jnp.ones_like(z) if result is None else result


def _focal_elts(x, t, alpha, gamma):
    # binary_cross_entropy_with_logits (reduction='none'), numerically stable:
    #   max(x, 0) - x*t + log(1 + exp(-|x|))
    bce = jnp.maximum(x, 0.0) - x * t + jnp.log1p(jnp.exp(-jnp.abs(x)))
    at = alpha * t + (1.0 - alpha) * (1.0 - t)
    pt = jnp.exp(-bce)
    z = 1.0 - pt
    g = float(gamma)
    if g == int(g) and 0.0 <= g <= 16.0:
        mod = _int_pow(z, int(g))          # gamma==2 fast path: z*z (no exp/log)
    else:
        mod = jnp.power(z, g)
    return at * mod * bce


def _focal_partial_sum_kernel(x_ref, t_ref, o_ref, *, alpha, gamma, n_valid,
                              block_rows):
    i = pl.program_id(0)
    last = pl.num_programs(0) - 1

    x = x_ref[...].astype(jnp.float32)
    t = t_ref[...].astype(jnp.float32)
    fl = _focal_elts(x, t, alpha, gamma)

    def _partial(v):
        # (block_rows, 128) -> (block_rows//8, 8, 128) -> sum over leading axis.
        # Reshape splits the sublane dim on a tile boundary (layout-preserving).
        return v.reshape(-1, 8, LANES).sum(axis=0)

    @pl.when(i < last)
    def _steady():
        o_ref[...] = _partial(fl)

    @pl.when(i == last)
    def _tail():
        # Mask padded / out-of-bounds elements; only the last block pays this.
        full_rows = n_valid // LANES
        rem = n_valid % LANES
        row = jax.lax.broadcasted_iota(jnp.int32, fl.shape, 0)
        g_row = i * block_rows + row
        if rem == 0:
            valid = g_row < full_rows
        else:
            lane = jax.lax.broadcasted_iota(jnp.int32, fl.shape, 1)
            valid = (g_row < full_rows) | ((g_row == full_rows) & (lane < rem))
        o_ref[...] = _partial(jnp.where(valid, fl, 0.0))


def _focal_elementwise_kernel(x_ref, t_ref, o_ref, *, alpha, gamma):
    x = x_ref[...].astype(jnp.float32)
    t = t_ref[...].astype(jnp.float32)
    o_ref[...] = _focal_elts(x, t, alpha, gamma).astype(o_ref.dtype)


@functools.partial(jax.jit, static_argnames=("alpha", "gamma", "reduction"))
def _custom_focal_loss_impl(inputs, targets, alpha, gamma, reduction):
    orig_shape = inputs.shape
    out_dtype = inputs.dtype
    n = int(np.prod(orig_shape)) if orig_shape else 1

    x = jnp.ravel(inputs)
    t = jnp.ravel(targets)

    # Pad only up to the next (8*128) boundary (<= 1023 elements).
    n_pad = ((n + MIN_TILE_ELEMS - 1) // MIN_TILE_ELEMS) * MIN_TILE_ELEMS
    if n_pad != n:
        x = jnp.pad(x, (0, n_pad - n))
        t = jnp.pad(t, (0, n_pad - n))
    rows = n_pad // LANES                      # multiple of 8
    block_rows = min(TILE_ROWS, rows)          # multiple of 8
    n_blocks = (rows + block_rows - 1) // block_rows

    x2 = x.reshape(rows, LANES)
    t2 = t.reshape(rows, LANES)

    cparams = pltpu.CompilerParams(
        dimension_semantics=("parallel",),
        vmem_limit_bytes=VMEM_LIMIT_BYTES,
    )
    in_specs = [
        pl.BlockSpec((block_rows, LANES), lambda i: (i, 0)),
        pl.BlockSpec((block_rows, LANES), lambda i: (i, 0)),
    ]

    if reduction in ("mean", "sum"):
        kernel = functools.partial(
            _focal_partial_sum_kernel,
            alpha=float(alpha), gamma=float(gamma),
            n_valid=n, block_rows=block_rows,
        )
        partials = pl.pallas_call(
            kernel,
            out_shape=jax.ShapeDtypeStruct((n_blocks * 8, LANES), jnp.float32),
            grid_spec=pltpu.PrefetchScalarGridSpec(
                num_scalar_prefetch=0,
                grid=(n_blocks,),
                in_specs=in_specs,
                out_specs=pl.BlockSpec((8, LANES), lambda i: (i, 0)),
            ),
            compiler_params=cparams,
        )(x2, t2)
        total = jnp.sum(partials)
        if reduction == "mean":
            total = total / jnp.float32(n)
        return total.astype(out_dtype)
    else:  # 'none'
        kernel = functools.partial(
            _focal_elementwise_kernel, alpha=float(alpha), gamma=float(gamma)
        )
        out2 = pl.pallas_call(
            kernel,
            out_shape=jax.ShapeDtypeStruct((rows, LANES), out_dtype),
            grid_spec=pltpu.PrefetchScalarGridSpec(
                num_scalar_prefetch=0,
                grid=(n_blocks,),
                in_specs=in_specs,
                out_specs=pl.BlockSpec((block_rows, LANES), lambda i: (i, 0)),
            ),
            compiler_params=cparams,
        )(x2, t2)
        return out2.reshape(-1)[:n].reshape(orig_shape)


def custom_focal_loss(inputs, targets, alpha=0.25, gamma=2.0, reduction="mean"):
    """Pallas implementation of CustomFocalLoss.forward."""
    return _custom_focal_loss_impl(
        inputs, targets, alpha=float(alpha), gamma=float(gamma),
        reduction=reduction,
    )


def _reference(inputs, targets, alpha=0.25, gamma=2.0, reduction="mean"):
    x = inputs.astype(jnp.float32)
    t = targets.astype(jnp.float32)
    bce = jnp.maximum(x, 0.0) - x * t + jnp.log1p(jnp.exp(-jnp.abs(x)))
    at = alpha * t + (1 - alpha) * (1 - t)
    pt = jnp.exp(-bce)
    fl = at * (1 - pt) ** gamma * bce
    if reduction == "mean":
        return jnp.mean(fl)
    if reduction == "sum":
        return jnp.sum(fl)
    return fl


if __name__ == "__main__":
    key = jax.random.PRNGKey(0)
    k1, k2 = jax.random.split(key)
    # Module has no weights of its own; only alpha/gamma scalars (set below).
    x = jax.random.normal(k1, (2, 4, 16, 16), dtype=jnp.float32)  # logits
    t = (jax.random.uniform(k2, (2, 4, 16, 16)) > 0.5).astype(jnp.float32)

    out = custom_focal_loss(x, t, alpha=0.25, gamma=2.0, reduction="mean")
    out = jax.block_until_ready(out)
    ref = _reference(x, t, alpha=0.25, gamma=2.0, reduction="mean")
    assert np.allclose(np.asarray(out), np.asarray(ref), rtol=1e-5, atol=1e-6), (
        out, ref)

    out_sum = jax.block_until_ready(
        custom_focal_loss(x, t, alpha=0.25, gamma=2.0, reduction="sum"))
    ref_sum = _reference(x, t, alpha=0.25, gamma=2.0, reduction="sum")
    assert np.allclose(np.asarray(out_sum), np.asarray(ref_sum),
                       rtol=1e-5, atol=1e-5), (out_sum, ref_sum)

    out_none = jax.block_until_ready(
        custom_focal_loss(x, t, reduction="none"))
    ref_none = _reference(x, t, reduction="none")
    assert np.allclose(np.asarray(out_none), np.asarray(ref_none),
                       rtol=1e-5, atol=1e-6)

    print("KERNEL_OK")
</pallas_src>

<mosaic_0001>
module attributes {stable_mosaic.version = 11 : i64} {
  func.func @_focal_partial_sum_kernel(%arg0: i32, %arg1: memref<16x128xf32, #tpu.memory_space<vmem>>, %arg2: memref<16x128xf32, #tpu.memory_space<vmem>>, %arg3: memref<8x128xf32, #tpu.memory_space<vmem>>) attributes {dimension_semantics = [#tpu.dimension_semantics<parallel>], iteration_bounds = array<i64: 1>, scalar_prefetch = 0 : i64, scratch_operands = 0 : i64, tpu.core_type = #tpu.core_type<tc>, window_params = [{transform_indices = @transform_0, window_bounds = array<i64: 16, 128>}, {transform_indices = @transform_1, window_bounds = array<i64: 16, 128>}, {transform_indices = @transform_2, window_bounds = array<i64: 8, 128>}]} {
    %c0 = arith.constant 0 : index
    %c0_0 = arith.constant 0 : index
    %0 = vector.load %arg1[%c0, %c0_0] : memref<16x128xf32, #tpu.memory_space<vmem>>, vector<16x128xf32>
    %c0_1 = arith.constant 0 : index
    %c0_2 = arith.constant 0 : index
    %1 = vector.load %arg2[%c0_1, %c0_2] : memref<16x128xf32, #tpu.memory_space<vmem>>, vector<16x128xf32>
    %cst = arith.constant 0.000000e+00 : f32
    %2 = vector.broadcast %cst : f32 to vector<16x128xf32>
    %3 = arith.maximumf %0, %2 : vector<16x128xf32>
    %4 = arith.mulf %0, %1 : vector<16x128xf32>
    %5 = arith.subf %3, %4 : vector<16x128xf32>
    %6 = math.absf %0 : vector<16x128xf32>
    %cst_3 = arith.constant 0.000000e+00 : f32
    %7 = vector.broadcast %cst_3 : f32 to vector<16x128xf32>
    %8 = arith.subf %7, %6 : vector<16x128xf32>
    %9 = math.exp %8 : vector<16x128xf32>
    %10 = math.log1p %9 : vector<16x128xf32>
    %11 = arith.addf %5, %10 : vector<16x128xf32>
    %cst_4 = arith.constant 2.500000e-01 : f32
    %12 = vector.broadcast %cst_4 : f32 to vector<16x128xf32>
    %13 = arith.mulf %12, %1 : vector<16x128xf32>
    %cst_5 = arith.constant 1.000000e+00 : f32
    %14 = vector.broadcast %cst_5 : f32 to vector<16x128xf32>
    %15 = arith.subf %14, %1 : vector<16x128xf32>
    %cst_6 = arith.constant 7.500000e-01 : f32
    %16 = vector.broadcast %cst_6 : f32 to vector<16x128xf32>
    %17 = arith.mulf %16, %15 : vector<16x128xf32>
    %18 = arith.addf %13, %17 : vector<16x128xf32>
    %cst_7 = arith.constant 0.000000e+00 : f32
    %19 = vector.broadcast %cst_7 : f32 to vector<16x128xf32>
    %20 = arith.subf %19, %11 : vector<16x128xf32>
    %21 = math.exp %20 : vector<16x128xf32>
    %cst_8 = arith.constant 1.000000e+00 : f32
    %22 = vector.broadcast %cst_8 : f32 to vector<16x128xf32>
    %23 = arith.subf %22, %21 : vector<16x128xf32>
    %24 = arith.mulf %23, %23 : vector<16x128xf32>
    %25 = arith.mulf %18, %24 : vector<16x128xf32>
    %26 = arith.mulf %25, %11 : vector<16x128xf32>
    %c0_i32 = arith.constant 0 : i32
    %27 = arith.cmpi slt, %arg0, %c0_i32 : i32
    %28 = arith.extui %27 : i1 to i32
    %c0_i32_9 = arith.constant 0 : i32
    %29 = arith.cmpi ne, %28, %c0_i32_9 : i32
    scf.if %29 {
      %33 = vector.shape_cast %26 : vector<16x128xf32> to vector<2x8x128xf32>
      %cst_12 = arith.constant dense<0.000000e+00> : vector<8x128xf32>
      %34 = vector.multi_reduction <add>, %33, %cst_12 [0] : vector<2x8x128xf32> to vector<8x128xf32>
      %c0_13 = arith.constant 0 : index
      %c0_14 = arith.constant 0 : index
      %35 = vector.load %arg3[%c0_13, %c0_14] : memref<8x128xf32, #tpu.memory_space<vmem>>, vector<8x128xf32>
      tpu.vector_store %arg3[%c0_13, %c0_14], %34 {strides = array<i32>} : memref<8x128xf32, #tpu.memory_space<vmem>>, vector<8x128xf32>,
    } else {
    }
    %c0_i32_10 = arith.constant 0 : i32
    %30 = arith.cmpi eq, %arg0, %c0_i32_10 : i32
    %31 = arith.extui %30 : i1 to i32
    %c0_i32_11 = arith.constant 0 : i32
    %32 = arith.cmpi ne, %31, %c0_i32_11 : i32
    scf.if %32 {
      %33 = tpu.iota {dimensions = array<i32: 0>} : vector<16x128xi32>
      %c16_i32 = arith.constant 16 : i32
      %34 = arith.muli %arg0, %c16_i32 : i32
      %35 = vector.broadcast %34 : i32 to vector<16x128xi32>
      %36 = arith.addi %35, %33 : vector<16x128xi32>
      %c16_i32_12 = arith.constant 16 : i32
      %37 = vector.broadcast %c16_i32_12 : i32 to vector<16x128xi32>
      %38 = arith.cmpi slt, %36, %37 : vector<16x128xi32>
      %cst_13 = arith.constant 0.000000e+00 : f32
      %39 = vector.broadcast %cst_13 : f32 to vector<16x128xf32>
      %40 = arith.select %38, %26, %39 : vector<16x128xi1>, vector<16x128xf32>
      %41 = vector.shape_cast %40 : vector<16x128xf32> to vector<2x8x128xf32>
      %cst_14 = arith.constant dense<0.000000e+00> : vector<8x128xf32>
      %42 = vector.multi_reduction <add>, %41, %cst_14 [0] : vector<2x8x128xf32> to vector<8x128xf32>
      %c0_15 = arith.constant 0 : index
      %c0_16 = arith.constant 0 : index
      %43 = vector.load %arg3[%c0_15, %c0_16] : memref<8x128xf32, #tpu.memory_space<vmem>>, vector<8x128xf32>
      tpu.vector_store %arg3[%c0_15, %c0_16], %42 {strides = array<i32>} : memref<8x128xf32, #tpu.memory_space<vmem>>, vector<8x128xf32>,
    } else {
    }
    return
  }
  func.func @transform_0(%arg0: i32) -> (i32, i32) {
    %c0_i32 = arith.constant 0 : i32
    %c0_i32_0 = arith.constant 0 : i32
    return %arg0, %c0_i32 : i32, i32
  }
  func.func @transform_1(%arg0: i32) -> (i32, i32) {
    %c0_i32 = arith.constant 0 : i32
    %c0_i32_0 = arith.constant 0 : i32
    return %arg0, %c0_i32 : i32, i32
  }
  func.func @transform_2(%arg0: i32) -> (i32, i32) {
    %c0_i32 = arith.constant 0 : i32
    %c0_i32_0 = arith.constant 0 : i32
    return %arg0, %c0_i32 : i32, i32
  }
}

</mosaic_0001>

<bundles_post_ra>
// kernel: _custom_focal_loss_impl.1
= control target key start
LH: loop header
LB: loop body
LE: loop exit
PB: predicated region body
PF: predicated region fallthrough
CT: control target
= control target key end

     0   :  { %s140_s0 = inlined_call_operand.vmem [shape: f32[16,128], index: 0, kind: input, shape index: {}]   ;;  %s141_s1 = inlined_call_operand.vmem [shape: f32[16,128], index: 1, kind: input, shape index: {}]   ;;  %s142_s2 = inlined_call_operand.vmem [shape: f32[8,128], index: 2, kind: output, shape index: {}]  }
   0x1   :  { %v11_v0 = vld [vmem:[%s140_s0] sm:$0xff]  ;;  %v12_v1 = vld [vmem:[%s140_s0 + $0x8] sm:$0xff] }
   0x2   :  { %v21_v2 = vand.u32 2147483647, %v11_v0  ;;  %v22_v3 = vand.u32 2147483647, %v12_v1  ;;  %v13_v12 = vld [vmem:[%s141_s1] sm:$0xff]  ;;  %v14_v15 = vld [vmem:[%s141_s1 + $0x8] sm:$0xff] }
   0x3   :  { %v15_v17 = vmax.f32 %v11_v0, 0.0  ;;  %v17_v18 = vmul.f32 %v13_v12, %v11_v0  ;;  %v16_v21 = vmax.f32 %v12_v1, 0.0  ;;  %v18_v22 = vmul.f32 %v14_v15, %v12_v1 }
   0x4   :  { %v23_v4 = vsub.f32 0.0, %v21_v2  ;;  %v24_v5 = vsub.f32 0.0, %v22_v3  ;;  %v51_v39 = vsub.f32 1.0, %v13_v12  ;;  %v52_v41 = vsub.f32 1.0, %v14_v15 }
   0x5   :  { %v19_v26 = vsub.f32 %v15_v17, %v17_v18  ;;  %v20_v29 = vsub.f32 %v16_v21, %v18_v22  ;;  %v49_v42 = vmul.f32 0.25, %v13_v12  ;;  %v50_v44 = vmul.f32 0.25, %v14_v15 }
   0x6   :  { %v25_v6 = vmul.f32 1.442695, %v23_v4  ;;  %v27_v7 = vmul.f32 1.442695, %v24_v5  ;;  %v53_v43 = vmul.f32 0.75, %v51_v39  ;;  %v54_v45 = vmul.f32 0.75, %v52_v41 }
   0x8   :  { %98 = vpow2.f32 %v25_v6  ;;  %v55_v48 = vadd.f32 %v53_v43, %v49_v42  ;;  %v56_v50 = vadd.f32 %v54_v45, %v50_v44 }
   0x9   :  { %100 = vpow2.f32 %v27_v7 }
   0xe   :  { %v99_v8 = vpop.eup %98 }
   0xf   :  { %v101_v9 = vpop.eup %100  ;;  %v29_v10 = vadd.f32 1.0, %v99_v8  ;;  %v32_v11 = vmul.f32 -0.5, %v99_v8  ;;  %v35_v19 = vand.u32 2147483647, %v99_v8 }
  0x10   :  { %v38_v13 = vadd.f32 1.0, %v101_v9  ;;  %v41_v14 = vmul.f32 -0.5, %v101_v9  ;;  %v44_v23 = vand.u32 2147483647, %v101_v9 }
  0x11   :  { %102 = vlog2.f32 %v29_v10  ;;  %v33_v16 = vadd.f32 1.0, %v32_v11  ;;  %vm36_vm0 = vcmp.lt.f32.partialorder %v35_v19, 0.0004427343 }
  0x12   :  { %104 = vlog2.f32 %v38_v13  ;;  %v42_v20 = vadd.f32 1.0, %v41_v14  ;;  %vm45_vm1 = vcmp.lt.f32.partialorder %v44_v23, 0.0004427343 }
  0x13   :  { %v34_v24 = vmul.f32 %v99_v8, %v33_v16 }
  0x14   :  { %v43_v27 = vmul.f32 %v101_v9, %v42_v20 }
  0x17   :  { %v103_v25 = vpop.eup %102 }
  0x18   :  { %v105_v28 = vpop.eup %104  ;;  %v31_v30 = vmul.f32 0.6931472, %v103_v25 }
  0x19   :  { %v40_v31 = vmul.f32 0.6931472, %v105_v28 }
  0x1a   :  { %v37_v32 = vsel %vm36_vm0, %v34_v24, %v31_v30 }
  0x1b   :  { %v46_v33 = vsel %vm45_vm1, %v43_v27, %v40_v31  ;;  %v47_v34 = vadd.f32 %v37_v32, %v19_v26 }
  0x1c   :  { %v48_v35 = vadd.f32 %v46_v33, %v20_v29 }
  0x1d   :  { %v57_v36 = vsub.f32 0.0, %v47_v34 }
  0x1e   :  { %v58_v37 = vsub.f32 0.0, %v48_v35 }
  0x1f   :  { %v59_v38 = vmul.f32 1.442695, %v57_v36 }
  0x20   :  { %v61_v40 = vmul.f32 1.442695, %v58_v37 }
  0x21   :  { %106 = vpow2.f32 %v59_v38 }
  0x22   :  { %108 = vpow2.f32 %v61_v40 }
  0x27   :  { %v107_v46 = vpop.eup %106 }
  0x28   :  { %v109_v47 = vpop.eup %108  ;;  %v63_v49 = vsub.f32 1.0, %v107_v46 }
  0x29   :  { %v64_v51 = vsub.f32 1.0, %v109_v47 }
  0x2a   :  { %v65_v52 = vmul.f32 %v63_v49, %v63_v49 }
  0x2b   :  { %v66_v53 = vmul.f32 %v64_v51, %v64_v51 }
  0x2c   :  { %v67_v54 = vmul.f32 %v65_v52, %v55_v48 }
  0x2d   :  { %v68_v55 = vmul.f32 %v66_v53, %v56_v50 }
  0x2e   :  { %v69_v56 = vmul.f32 %v67_v54, %v47_v34 }
  0x2f   :  { %v70_v57 = vmul.f32 %v68_v55, %v48_v35 }
  0x31   :  { %v92_v58 = vadd.f32 %v70_v57, %v69_v56 }
  0x33   :  { %93 = vst [vmem:[%s142_s2] sm:$0xff] %v92_v58 }

</bundles_post_ra>
